<compile_context>
chip_gen: v7x
topology: tpu7x:2x2x1
jax: 0.10.0
libtpu: 0.0.40
codegen_flags: <defaults>
</compile_context>

<pallas_src>
import math
from functools import partial

import jax
import jax.numpy as jnp
from jax import lax
from jax.experimental import pallas as pl
from jax.experimental.pallas import tpu as pltpu


# ----------------------------------------------------------------------------
# Beta schedule / diffusion buffers (plain JAX "glue" — mirrors __init__)
# ----------------------------------------------------------------------------
def cosine_beta_schedule(timesteps, s=0.008):
    steps = timesteps + 1
    t = jnp.linspace(0.0, float(timesteps), steps, dtype=jnp.float32)
    alphas_cumprod = jnp.cos(((t / timesteps) + s) / (1 + s) * math.pi * 0.5) ** 2
    alphas_cumprod = alphas_cumprod / alphas_cumprod[0]
    betas = 1.0 - (alphas_cumprod[1:] / alphas_cumprod[:-1])
    return jnp.clip(betas, 0.0, 0.999)


def make_diffusion_buffers(timesteps=1000, objective="pred_noise"):
    betas = cosine_beta_schedule(timesteps)
    alphas = 1.0 - betas
    alphas_cumprod = jnp.cumprod(alphas)
    snr = alphas_cumprod / (1.0 - alphas_cumprod)
    if objective == "pred_noise":
        loss_weight = jnp.ones_like(snr)
    elif objective == "pred_x0":
        loss_weight = snr
    else:  # pred_v
        loss_weight = snr / (snr + 1.0)
    return dict(
        sqrt_alphas_cumprod=jnp.sqrt(alphas_cumprod).astype(jnp.float32),
        sqrt_one_minus_alphas_cumprod=jnp.sqrt(1.0 - alphas_cumprod).astype(jnp.float32),
        loss_weight=loss_weight.astype(jnp.float32),
    )


# ----------------------------------------------------------------------------
# Synthetic denoiser parameters (deterministic init)
# ----------------------------------------------------------------------------
def make_model_params(key, channels, hidden, emb_dim):
    ks = jax.random.split(key, 4)
    scale = 0.1
    W_t1 = scale * jax.random.normal(ks[0], (emb_dim, hidden), jnp.float32)
    b_t1 = jnp.zeros((1, hidden), jnp.float32)
    W_t2 = scale * jax.random.normal(ks[1], (hidden, hidden), jnp.float32)
    b_t2 = jnp.zeros((1, hidden), jnp.float32)
    W1 = scale * jax.random.normal(ks[2], (hidden, channels, 3), jnp.float32)   # (Cout, Cin, k)
    b1 = 0.01 * jnp.ones((1, hidden), jnp.float32)
    W2 = scale * jax.random.normal(ks[3], (channels, hidden, 3), jnp.float32)   # (Cout, Cin, k)
    b2 = 0.01 * jnp.ones((1, channels), jnp.float32)
    return dict(W_t1=W_t1, b_t1=b_t1, W_t2=W_t2, b_t2=b_t2,
                W1=W1, b1=b1, W2=W2, b2=b2)


def sinusoidal_emb(t, emb_dim):
    half = emb_dim // 2
    freqs = jnp.exp(jnp.arange(half, dtype=jnp.float32) * (-math.log(10000.0) / (half - 1)))
    arg = t.astype(jnp.float32)[:, None] * freqs[None, :]
    return jnp.concatenate([jnp.sin(arg), jnp.cos(arg)], axis=-1)  # (B, E)


def _gelu_tanh(x):
    return 0.5 * x * (1.0 + jnp.tanh(0.7978845608028654 * (x + 0.044715 * x * x * x)))


def _round_up(x, m):
    return (x + m - 1) // m * m


_TEMB_ROW = 8   # meta rows: 0=sqrt_acp, 1=sqrt_1m_acp, 2=loss scale, 8.. = temb


def _pick_tile_samples(batch, n_seq, target_cols):
    """Samples per lane tile: multiple of 128//gcd(128,N) so T=S*N is lane-dense,
    capped at the (padded) batch so we never create more padding than one tile."""
    spl = 128 // math.gcd(128, n_seq)
    max_needed = _round_up(batch, spl)
    s_tile = max(spl, (target_cols // (n_seq * spl)) * spl * 1)
    return int(min(s_tile, max_needed))


def _estimate_vmem_bytes(CP, HP, MR, S_tile, T_cols, io_itemsize):
    dbl = 2  # BlockSpec double buffering on the activation streams
    streams = 2 * dbl * CP * T_cols * io_itemsize                 # x0 + eps tiles
    resident = (S_tile * T_cols * 2                                # sel (bf16)
                + dbl * MR * S_tile * 2                            # meta blocks (bf16)
                + (HP * 3 * CP + 3 * CP * HP) * 2 + CP * 4         # weights + bias
                + dbl * 128 * 4)                                   # output tile
    temps = (2 * (3 * CP) + 2 * HP + MR + 2 * CP + 8) * T_cols * 4  # f32 temporaries
    return streams + resident + temps


# ----------------------------------------------------------------------------
# Pallas kernel: one lane tile (S_tile samples) of the fused diffusion loss
# ----------------------------------------------------------------------------
def diffusion_loss_kernel(n_seq,                                   # static: seq length N
                          x0_ref, eps_ref,                         # (CP, T) io_dtype
                          meta_ref,                                # (1, MR, S_tile) bf16
                          sel_ref,                                 # (S_tile, T) bf16, resident
                          w1_ref,                                  # (HP, 3*CP) bf16, K-stacked taps
                          w2_ref,                                  # (3*CP, HP) bf16, M-stacked taps
                          b2_ref,                                  # (CP, 1) f32
                          loss_ref):                               # (1, 1, 128) f32
    f32 = jnp.float32
    bf16 = jnp.bfloat16

    x0 = x0_ref[...].astype(f32)            # (CP, T)
    eps = eps_ref[...].astype(f32)           # (CP, T)
    cp, t_cols = x0.shape
    hp = w1_ref.shape[0]

    # Per-sample -> per-column broadcast with one tiny one-hot MXU matmul.
    # Replaces the old (H, L) per-column temb HBM stream entirely.
    meta_cols = jnp.dot(meta_ref[0], sel_ref[...],
                        preferred_element_type=f32)               # (MR, T)
    a_cols = meta_cols[0:1]                                       # sqrt(acp[t])
    s_cols = meta_cols[1:2]                                       # sqrt(1 - acp[t])
    sc_cols = meta_cols[2:3]                                      # loss_weight[t]/(N*C*B), 0 in pad
    temb_cols = meta_cols[_TEMB_ROW:_TEMB_ROW + hp]               # (HP, T), conv1 bias folded in

    # q_sample: x_t = sqrt(acp[t]) * x0 + sqrt(1 - acp[t]) * noise   (f32 VPU math)
    x = a_cols * x0 + s_cols * eps                                 # (CP, T)

    # Sample-boundary masks for the +/-1 conv taps ('same' zero padding; also
    # kills the wrap between samples packed side by side on the lane axis).
    col_in = lax.broadcasted_iota(jnp.int32, (1, t_cols), 1) % n_seq
    m_lo = (col_in != 0).astype(f32)                               # tap d=-1 invalid at n==0
    m_hi = (col_in != n_seq - 1).astype(f32)                       # tap d=+1 invalid at n==N-1

    # conv1: taps stacked along the CONTRACTION axis -> one (HP, 3*CP)@(3*CP, T) matmul.
    x_m1 = m_lo * pltpu.roll(x, shift=1, axis=1)                   # x[:, n-1]
    x_p1 = m_hi * pltpu.roll(x, shift=t_cols - 1, axis=1)          # x[:, n+1]  (non-neg shift)
    x_stack = jnp.concatenate([x_m1, x, x_p1], axis=0)             # (3*CP, T)
    h = jnp.dot(w1_ref[...], x_stack.astype(bf16),
                preferred_element_type=f32)                        # (HP, T) f32 acc
    h = _gelu_tanh(h + temb_cols)

    # conv2: taps stacked along the OUTPUT axis; roll/mask only CP rows per tap.
    ycat = jnp.dot(w2_ref[...], h.astype(bf16),
                   preferred_element_type=f32)                     # (3*CP, T)
    y0 = ycat[0:cp]                                                # tap k=0 -> needs h[:, n-1]
    y1 = ycat[cp:2 * cp]                                           # tap k=1
    y2 = ycat[2 * cp:3 * cp]                                       # tap k=2 -> needs h[:, n+1]
    model_out = (m_lo * pltpu.roll(y0, shift=1, axis=1)
                 + y1
                 + m_hi * pltpu.roll(y2, shift=t_cols - 1, axis=1)
                 + b2_ref[...])                                    # (CP, T)

    # objective='pred_noise': target = noise.  Channel-sum of squared error per
    # column, scaled by loss_weight[t]/(N*C*B) (0 on padded columns/samples).
    diff = model_out - eps
    per_col = jnp.sum(diff * diff, axis=0, keepdims=True)          # (1, T)
    tile_loss = jnp.sum(per_col * sc_cols, axis=1, keepdims=True)  # (1, 1) partial
    loss_ref[...] = jnp.broadcast_to(tile_loss.reshape(1, 1, 1), loss_ref.shape)


# ----------------------------------------------------------------------------
# Wrapper: GaussianDiffusion1D.forward (training loss)
# ----------------------------------------------------------------------------
def gaussian_diffusion_forward(img_ncl, t, noise_ncl, params, buffers, emb_dim,
                               *, io_dtype=jnp.float32, target_tile_cols=None):
    """img_ncl, noise_ncl: (B, C, N) float32 (PyTorch NCL layout). t: (B,) int32.
    io_dtype=jnp.bfloat16 halves HBM traffic on the activation streams (v6e/v7x);
    accumulation and elementwise math stay f32."""
    B, C, N = img_ncl.shape
    H = params["W1"].shape[0]
    f32, bf16 = jnp.float32, jnp.bfloat16

    io_itemsize = jnp.dtype(io_dtype).itemsize
    if target_tile_cols is None:
        target_tile_cols = 2048 if io_itemsize >= 4 else 4096     # per review

    CP = _round_up(C, 8)
    HP = _round_up(H, 8)
    MR = _TEMB_ROW + HP

    S_tile = _pick_tile_samples(B, N, target_tile_cols)           # samples per lane tile
    T_cols = S_tile * N                                           # columns per tile (%128 == 0)
    B_pad = _round_up(B, S_tile)
    num_tiles = B_pad // S_tile

    # ---- activations: (B, C, N) -> (CP, B_pad*N), channels on sublanes ----
    def to_cols(x_ncl):
        x = jnp.pad(x_ncl.astype(f32), ((0, B_pad - B), (0, CP - C), (0, 0)))
        x = jnp.transpose(x, (1, 0, 2)).reshape(CP, B_pad * N)
        return x.astype(io_dtype)

    x0_cols = to_cols(img_ncl)
    eps_cols = to_cols(noise_ncl)

    # ---- per-sample meta: schedule gathers + time-embedding MLP (hoisted) ----
    a_b = buffers["sqrt_alphas_cumprod"][t]                        # (B,)
    s_b = buffers["sqrt_one_minus_alphas_cumprod"][t]              # (B,)
    sc_b = buffers["loss_weight"][t] / float(N * C * B)            # folds per-sample + batch mean

    emb = sinusoidal_emb(t, emb_dim)                               # (B, E)
    h1 = emb @ params["W_t1"] + params["b_t1"]
    h1 = h1 * jax.nn.sigmoid(h1)                                   # SiLU
    temb = h1 @ params["W_t2"] + params["b_t2"]                    # (B, H)
    temb = temb + params["b1"]                                     # fold conv1 bias into temb

    def pad_b(v):
        return jnp.pad(v.astype(f32), (0, B_pad - B))

    meta = jnp.zeros((MR, B_pad), f32)
    meta = meta.at[0].set(pad_b(a_b))
    meta = meta.at[1].set(pad_b(s_b))
    meta = meta.at[2].set(pad_b(sc_b))
    temb_pad = jnp.pad(temb.astype(f32), ((0, B_pad - B), (0, HP - H)))
    meta = meta.at[_TEMB_ROW:_TEMB_ROW + HP].set(temb_pad.T)
    meta = meta.reshape(MR, num_tiles, S_tile).transpose(1, 0, 2).astype(bf16)  # (nt, MR, S)

    # one-hot sample-selection matrix (identical for every tile, stays VMEM-resident)
    col_sample = jnp.arange(T_cols, dtype=jnp.int32) // N
    sel = (col_sample[None, :] == jnp.arange(S_tile, dtype=jnp.int32)[:, None]).astype(bf16)

    # ---- conv weights: conv1 K-stacked (HP, 3*CP), conv2 M-stacked (3*CP, HP) ----
    w1p = jnp.pad(params["W1"], ((0, HP - H), (0, CP - C), (0, 0)))        # (HP, CP, 3)
    w1_k = jnp.transpose(w1p, (0, 2, 1)).reshape(HP, 3 * CP).astype(bf16)  # cols [k*CP+c]
    w2p = jnp.pad(params["W2"], ((0, CP - C), (0, HP - H), (0, 0)))        # (CP, HP, 3)
    w2_m = jnp.transpose(w2p, (2, 0, 1)).reshape(3 * CP, HP).astype(bf16)  # rows [k*CP+c]
    b2_col = jnp.pad(params["b2"].reshape(C, 1), ((0, CP - C), (0, 0))).astype(f32)

    est = _estimate_vmem_bytes(CP, HP, MR, S_tile, T_cols, io_itemsize)
    vmem_limit = int(min(48 * 2 ** 20, max(32 * 2 ** 20, 2 * est)))        # v7x-safe (<64 MiB)

    out = pl.pallas_call(
        partial(diffusion_loss_kernel, N),
        out_shape=jax.ShapeDtypeStruct((num_tiles, 1, 128), jnp.float32),
        grid_spec=pltpu.PrefetchScalarGridSpec(
            num_scalar_prefetch=0,
            grid=(num_tiles,),
            in_specs=[
                pl.BlockSpec((CP, T_cols), lambda j: (0, j)),      # x_start lane tile
                pl.BlockSpec((CP, T_cols), lambda j: (0, j)),      # noise lane tile
                pl.BlockSpec((1, MR, S_tile), lambda j: (j, 0, 0)),  # per-sample meta (tiny)
                pl.BlockSpec((S_tile, T_cols), lambda j: (0, 0)),  # one-hot broadcast (resident)
                pl.BlockSpec((HP, 3 * CP), lambda j: (0, 0)),      # conv1 weights (resident)
                pl.BlockSpec((3 * CP, HP), lambda j: (0, 0)),      # conv2 weights (resident)
                pl.BlockSpec((CP, 1), lambda j: (0, 0)),           # conv2 bias (resident)
            ],
            out_specs=pl.BlockSpec((1, 1, 128), lambda j: (j, 0, 0)),
        ),
        compiler_params=pltpu.CompilerParams(
            dimension_semantics=("parallel",),
            vmem_limit_bytes=vmem_limit),
    )(x0_cols, eps_cols, meta, sel, w1_k, w2_m, b2_col)

    # per-tile partials already carry loss_weight[t]/(N*C*B); sum to the scalar loss
    return out[:, 0, 0].sum()


# ----------------------------------------------------------------------------
# Pure-JAX f32 reference (for correctness check)
# ----------------------------------------------------------------------------
def reference_forward(img_ncl, t, noise_ncl, params, buffers, emb_dim):
    B, C, N = img_ncl.shape
    a = buffers["sqrt_alphas_cumprod"][t][:, None, None]
    s = buffers["sqrt_one_minus_alphas_cumprod"][t][:, None, None]
    x = a * img_ncl + s * noise_ncl                                # q_sample, (B, C, N)

    emb = sinusoidal_emb(t, emb_dim)
    h1 = emb @ params["W_t1"] + params["b_t1"]
    h1 = h1 * jax.nn.sigmoid(h1)
    temb = h1 @ params["W_t2"] + params["b_t2"]                    # (B, H)

    def conv1d(x_ncl, W, b):
        xp = jnp.pad(x_ncl, ((0, 0), (0, 0), (1, 1)))
        out = jnp.zeros((B, W.shape[0], N), jnp.float32)
        for k in range(3):
            out = out + jnp.einsum("oc,bcn->bon", W[:, :, k], xp[:, :, k:k + N])
        return out + b[0][None, :, None]

    h = conv1d(x, params["W1"], params["b1"]) + temb[:, :, None]
    h = _gelu_tanh(h)
    out = conv1d(h, params["W2"], params["b2"])                    # (B, C, N)

    mse = jnp.mean((out - noise_ncl) ** 2, axis=(1, 2))
    return (mse * buffers["loss_weight"][t]).mean()


if __name__ == "__main__":
    B, C, N = 2, 4, 16        # batch, channels (= model.out_dim), seq_length
    H, E = 32, 32             # denoiser hidden dim, time-embedding dim
    TIMESTEPS = 1000

    key = jax.random.PRNGKey(0)
    k_img, k_t, k_noise, k_params = jax.random.split(key, 4)

    img = jax.random.normal(k_img, (B, C, N), jnp.float32)                   # NCL input
    t = jax.random.randint(k_t, (B,), 0, TIMESTEPS, dtype=jnp.int32)         # forward(): randint
    noise = jax.random.normal(k_noise, (B, C, N), jnp.float32)               # randn_like(x_start)

    params = make_model_params(k_params, C, H, E)
    buffers = make_diffusion_buffers(TIMESTEPS, objective="pred_noise")

    # io_dtype=jnp.bfloat16 halves HBM traffic in production; f32 here for the check.
    loss = gaussian_diffusion_forward(img, t, noise, params, buffers, E,
                                      io_dtype=jnp.float32)
    loss = jax.block_until_ready(loss)

    ref = reference_forward(img, t, noise, params, buffers, E)
    # MXU operands are bf16 (f32 accumulation), so allow bf16-level tolerance.
    assert jnp.allclose(loss, ref, rtol=2e-2, atol=1e-3), (loss, ref)
    print("KERNEL_OK")
</pallas_src>

<mosaic_0001>
module attributes {stable_mosaic.version = 11 : i64} {
  func.func @diffusion_loss_kernel(%arg0: i32, %arg1: memref<8x128xf32, #tpu.memory_space<vmem>>, %arg2: memref<8x128xf32, #tpu.memory_space<vmem>>, %arg3: memref<1x40x8xbf16, #tpu.memory_space<vmem>>, %arg4: memref<8x128xbf16, #tpu.memory_space<vmem>>, %arg5: memref<32x24xbf16, #tpu.memory_space<vmem>>, %arg6: memref<24x32xbf16, #tpu.memory_space<vmem>>, %arg7: memref<8x1xf32, #tpu.memory_space<vmem>>, %arg8: memref<1x1x128xf32, #tpu.memory_space<vmem>>) attributes {dimension_semantics = [#tpu.dimension_semantics<parallel>], iteration_bounds = array<i64: 1>, scalar_prefetch = 0 : i64, scratch_operands = 0 : i64, tpu.core_type = #tpu.core_type<tc>, window_params = [{transform_indices = @transform_0, window_bounds = array<i64: 8, 128>}, {transform_indices = @transform_1, window_bounds = array<i64: 8, 128>}, {transform_indices = @transform_2, window_bounds = array<i64: 1, 40, 8>}, {pipeline_mode = #tpu.pipeline_mode<synchronous>, transform_indices = @transform_3, window_bounds = array<i64: 8, 128>}, {pipeline_mode = #tpu.pipeline_mode<synchronous>, transform_indices = @transform_4, window_bounds = array<i64: 32, 24>}, {pipeline_mode = #tpu.pipeline_mode<synchronous>, transform_indices = @transform_5, window_bounds = array<i64: 24, 32>}, {pipeline_mode = #tpu.pipeline_mode<synchronous>, transform_indices = @transform_6, window_bounds = array<i64: 8, 1>}, {transform_indices = @transform_7, window_bounds = array<i64: 1, 1, 128>}]} {
    %c0 = arith.constant 0 : index
    %c0_0 = arith.constant 0 : index
    %0 = vector.load %arg1[%c0, %c0_0] : memref<8x128xf32, #tpu.memory_space<vmem>>, vector<8x128xf32>
    %c0_1 = arith.constant 0 : index
    %c0_2 = arith.constant 0 : index
    %1 = vector.load %arg2[%c0_1, %c0_2] : memref<8x128xf32, #tpu.memory_space<vmem>>, vector<8x128xf32>
    %c0_3 = arith.constant 0 : index
    %c0_4 = arith.constant 0 : index
    %c0_5 = arith.constant 0 : index
    %2 = vector.load %arg3[%c0_3, %c0_4, %c0_5] : memref<1x40x8xbf16, #tpu.memory_space<vmem>>, vector<1x40x8xbf16>
    %3 = vector.shape_cast %2 : vector<1x40x8xbf16> to vector<40x8xbf16>
    %c0_6 = arith.constant 0 : index
    %c0_7 = arith.constant 0 : index
    %4 = vector.load %arg4[%c0_6, %c0_7] : memref<8x128xbf16, #tpu.memory_space<vmem>>, vector<8x128xbf16>
    %cst = arith.constant dense<0.000000e+00> : vector<40x128xf32>
    %5 = tpu.matmul %3, %4, %cst {dimension_numbers = #tpu.dot_dimension_numbers<[1], [0], [0], [1], [0, 0, 1, 1], [], []>} : vector<40x8xbf16>, vector<8x128xbf16>, vector<40x128xf32> -> vector<40x128xf32>
    %6 = vector.extract_strided_slice %5 {offsets = [0, 0], sizes = [1, 128], strides = [1, 1]} : vector<40x128xf32> to vector<1x128xf32>
    %7 = vector.extract_strided_slice %5 {offsets = [1, 0], sizes = [1, 128], strides = [1, 1]} : vector<40x128xf32> to vector<1x128xf32>
    %8 = vector.extract_strided_slice %5 {offsets = [2, 0], sizes = [1, 128], strides = [1, 1]} : vector<40x128xf32> to vector<1x128xf32>
    %9 = vector.extract_strided_slice %5 {offsets = [8, 0], sizes = [32, 128], strides = [1, 1]} : vector<40x128xf32> to vector<32x128xf32>
    %10 = vector.broadcast %6 : vector<1x128xf32> to vector<8x128xf32>
    %11 = arith.mulf %10, %0 : vector<8x128xf32>
    %12 = vector.broadcast %7 : vector<1x128xf32> to vector<8x128xf32>
    %13 = arith.mulf %12, %1 : vector<8x128xf32>
    %14 = arith.addf %11, %13 : vector<8x128xf32>
    %15 = tpu.iota {dimensions = array<i32: 1>} : vector<1x128xi32>
    %c16_i32 = arith.constant 16 : i32
    %c0_i32 = arith.constant 0 : i32
    %16 = arith.cmpi eq, %c16_i32, %c0_i32 : i32
    %c1_i32 = arith.constant 1 : i32
    %17 = arith.select %16, %c1_i32, %c16_i32 : i32
    %18 = vector.broadcast %17 : i32 to vector<1x128xi32>
    %19 = arith.remsi %15, %18 : vector<1x128xi32>
    %c0_i32_8 = arith.constant 0 : i32
    %20 = vector.broadcast %c0_i32_8 : i32 to vector<1x128xi32>
    %21 = arith.cmpi ne, %19, %20 : vector<1x128xi32>
    %c0_i32_9 = arith.constant 0 : i32
    %22 = vector.broadcast %c0_i32_9 : i32 to vector<1x128xi32>
    %23 = arith.cmpi slt, %19, %22 : vector<1x128xi32>
    %c0_i32_10 = arith.constant 0 : i32
    %24 = arith.cmpi slt, %17, %c0_i32_10 : i32
    %25 = vector.broadcast %24 : i1 to vector<1x128xi1>
    %26 = vector.broadcast %25 : vector<1x128xi1> to vector<1x128xi1>
    %27 = arith.xori %23, %26 : vector<1x128xi1>
    %28 = arith.andi %27, %21 : vector<1x128xi1>
    %29 = vector.broadcast %17 : i32 to vector<1x128xi32>
    %30 = arith.addi %19, %29 : vector<1x128xi32>
    %31 = arith.select %28, %30, %19 : vector<1x128xi1>, vector<1x128xi32>
    %c0_i32_11 = arith.constant 0 : i32
    %32 = vector.broadcast %c0_i32_11 : i32 to vector<1x128xi32>
    %33 = arith.cmpi ne, %31, %32 : vector<1x128xi32>
    %34 = arith.extui %33 : vector<1x128xi1> to vector<1x128xi32>
    %35 = arith.sitofp %34 : vector<1x128xi32> to vector<1x128xf32>
    %c15_i32 = arith.constant 15 : i32
    %36 = vector.broadcast %c15_i32 : i32 to vector<1x128xi32>
    %37 = arith.cmpi ne, %31, %36 : vector<1x128xi32>
    %38 = arith.extui %37 : vector<1x128xi1> to vector<1x128xi32>
    %39 = arith.sitofp %38 : vector<1x128xi32> to vector<1x128xf32>
    %c1_i32_12 = arith.constant 1 : i32
    %40 = tpu.dynamic_rotate %14 by %c1_i32_12 dim 1 : vector<8x128xf32>, i32 -> vector<8x128xf32>
    %41 = vector.broadcast %35 : vector<1x128xf32> to vector<8x128xf32>
    %42 = arith.mulf %41, %40 : vector<8x128xf32>
    %c127_i32 = arith.constant 127 : i32
    %43 = tpu.dynamic_rotate %14 by %c127_i32 dim 1 : vector<8x128xf32>, i32 -> vector<8x128xf32>
    %44 = vector.broadcast %39 : vector<1x128xf32> to vector<8x128xf32>
    %45 = arith.mulf %44, %43 : vector<8x128xf32>
    %46 = tpu.concatenate %42, %14, %45 in 0 : vector<8x128xf32>, vector<8x128xf32>, vector<8x128xf32> -> vector<24x128xf32>
    %c0_13 = arith.constant 0 : index
    %c0_14 = arith.constant 0 : index
    %47 = vector.load %arg5[%c0_13, %c0_14] : memref<32x24xbf16, #tpu.memory_space<vmem>>, vector<32x24xbf16>
    %48 = arith.truncf %46 : vector<24x128xf32> to vector<24x128xbf16>
    %cst_15 = arith.constant dense<0.000000e+00> : vector<32x128xf32>
    %49 = tpu.matmul %47, %48, %cst_15 {dimension_numbers = #tpu.dot_dimension_numbers<[1], [0], [0], [1], [0, 0, 1, 1], [], []>} : vector<32x24xbf16>, vector<24x128xbf16>, vector<32x128xf32> -> vector<32x128xf32>
    %50 = arith.addf %49, %9 : vector<32x128xf32>
    %cst_16 = arith.constant 5.000000e-01 : f32
    %51 = vector.broadcast %cst_16 : f32 to vector<32x128xf32>
    %52 = arith.mulf %51, %50 : vector<32x128xf32>
    %cst_17 = arith.constant 4.471500e-02 : f32
    %53 = vector.broadcast %cst_17 : f32 to vector<32x128xf32>
    %54 = arith.mulf %53, %50 : vector<32x128xf32>
    %55 = arith.mulf %54, %50 : vector<32x128xf32>
    %56 = arith.mulf %55, %50 : vector<32x128xf32>
    %57 = arith.addf %50, %56 : vector<32x128xf32>
    %cst_18 = arith.constant 0.797884583 : f32
    %58 = vector.broadcast %cst_18 : f32 to vector<32x128xf32>
    %59 = arith.mulf %58, %57 : vector<32x128xf32>
    %60 = math.tanh %59 : vector<32x128xf32>
    %cst_19 = arith.constant 1.000000e+00 : f32
    %61 = vector.broadcast %cst_19 : f32 to vector<32x128xf32>
    %62 = arith.addf %61, %60 : vector<32x128xf32>
    %63 = arith.mulf %52, %62 : vector<32x128xf32>
    %c0_20 = arith.constant 0 : index
    %c0_21 = arith.constant 0 : index
    %64 = vector.load %arg6[%c0_20, %c0_21] : memref<24x32xbf16, #tpu.memory_space<vmem>>, vector<24x32xbf16>
    %65 = arith.truncf %63 : vector<32x128xf32> to vector<32x128xbf16>
    %cst_22 = arith.constant dense<0.000000e+00> : vector<24x128xf32>
    %66 = tpu.matmul %64, %65, %cst_22 {dimension_numbers = #tpu.dot_dimension_numbers<[1], [0], [0], [1], [0, 0, 1, 1], [], []>} : vector<24x32xbf16>, vector<32x128xbf16>, vector<24x128xf32> -> vector<24x128xf32>
    %67 = vector.extract_strided_slice %66 {offsets = [0, 0], sizes = [8, 128], strides = [1, 1]} : vector<24x128xf32> to vector<8x128xf32>
    %68 = vector.extract_strided_slice %66 {offsets = [8, 0], sizes = [8, 128], strides = [1, 1]} : vector<24x128xf32> to vector<8x128xf32>
    %69 = vector.extract_strided_slice %66 {offsets = [16, 0], sizes = [8, 128], strides = [1, 1]} : vector<24x128xf32> to vector<8x128xf32>
    %c1_i32_23 = arith.constant 1 : i32
    %70 = tpu.dynamic_rotate %67 by %c1_i32_23 dim 1 : vector<8x128xf32>, i32 -> vector<8x128xf32>
    %71 = vector.broadcast %35 : vector<1x128xf32> to vector<8x128xf32>
    %72 = arith.mulf %71, %70 : vector<8x128xf32>
    %73 = arith.addf %72, %68 : vector<8x128xf32>
    %c127_i32_24 = arith.constant 127 : i32
    %74 = tpu.dynamic_rotate %69 by %c127_i32_24 dim 1 : vector<8x128xf32>, i32 -> vector<8x128xf32>
    %75 = vector.broadcast %39 : vector<1x128xf32> to vector<8x128xf32>
    %76 = arith.mulf %75, %74 : vector<8x128xf32>
    %77 = arith.addf %73, %76 : vector<8x128xf32>
    %c0_25 = arith.constant 0 : index
    %c0_26 = arith.constant 0 : index
    %78 = vector.load %arg7[%c0_25, %c0_26] : memref<8x1xf32, #tpu.memory_space<vmem>>, vector<8x1xf32>
    %79 = vector.broadcast %78 : vector<8x1xf32> to vector<8x128xf32>
    %80 = arith.addf %77, %79 : vector<8x128xf32>
    %81 = arith.subf %80, %1 : vector<8x128xf32>
    %82 = arith.mulf %81, %81 : vector<8x128xf32>
    %cst_27 = arith.constant dense<0.000000e+00> : vector<128xf32>
    %83 = vector.multi_reduction <add>, %82, %cst_27 [0] : vector<8x128xf32> to vector<128xf32>
    %84 = vector.shape_cast %83 : vector<128xf32> to vector<1x128xf32>
    %85 = arith.mulf %84, %8 : vector<1x128xf32>
    %cst_28 = arith.constant dense<0.000000e+00> : vector<1xf32>
    %86 = vector.multi_reduction <add>, %85, %cst_28 [1] : vector<1x128xf32> to vector<1xf32>
    %87 = vector.shape_cast %86 : vector<1xf32> to vector<1x1xf32>
    %88 = vector.shape_cast %87 : vector<1x1xf32> to vector<1x1x1xf32>
    %89 = vector.shape_cast %88 : vector<1x1x1xf32> to vector<1x1x1xf32>
    %90 = vector.broadcast %89 : vector<1x1x1xf32> to vector<1x1x128xf32>
    %c0_29 = arith.constant 0 : index
    %c0_30 = arith.constant 0 : index
    %c0_31 = arith.constant 0 : index
    %91 = vector.load %arg8[%c0_29, %c0_30, %c0_31] : memref<1x1x128xf32, #tpu.memory_space<vmem>>, vector<1x1x128xf32>
    tpu.vector_store %arg8[%c0_29, %c0_30, %c0_31], %90 {strides = array<i32>} : memref<1x1x128xf32, #tpu.memory_space<vmem>>, vector<1x1x128xf32>,
    return
  }
  func.func @transform_0(%arg0: i32) -> (i32, i32) {
    %c0_i32 = arith.constant 0 : i32
    %c0_i32_0 = arith.constant 0 : i32
    return %c0_i32, %arg0 : i32, i32
  }
  func.func @transform_1(%arg0: i32) -> (i32, i32) {
    %c0_i32 = arith.constant 0 : i32
    %c0_i32_0 = arith.constant 0 : i32
    return %c0_i32, %arg0 : i32, i32
  }
  func.func @transform_2(%arg0: i32) -> (i32, i32, i32) {
    %c0_i32 = arith.constant 0 : i32
    %c0_i32_0 = arith.constant 0 : i32
    %c0_i32_1 = arith.constant 0 : i32
    return %arg0, %c0_i32, %c0_i32_0 : i32, i32, i32
  }
  func.func @transform_3(%arg0: i32) -> (i32, i32) {
    %c0_i32 = arith.constant 0 : i32
    %c0_i32_0 = arith.constant 0 : i32
    %c0_i32_1 = arith.constant 0 : i32
    return %c0_i32, %c0_i32_0 : i32, i32
  }
  func.func @transform_4(%arg0: i32) -> (i32, i32) {
    %c0_i32 = arith.constant 0 : i32
    %c0_i32_0 = arith.constant 0 : i32
    %c0_i32_1 = arith.constant 0 : i32
    return %c0_i32, %c0_i32_0 : i32, i32
  }
  func.func @transform_5(%arg0: i32) -> (i32, i32) {
    %c0_i32 = arith.constant 0 : i32
    %c0_i32_0 = arith.constant 0 : i32
    %c0_i32_1 = arith.constant 0 : i32
    return %c0_i32, %c0_i32_0 : i32, i32
  }
  func.func @transform_6(%arg0: i32) -> (i32, i32) {
    %c0_i32 = arith.constant 0 : i32
    %c0_i32_0 = arith.constant 0 : i32
    %c0_i32_1 = arith.constant 0 : i32
    return %c0_i32, %c0_i32_0 : i32, i32
  }
  func.func @transform_7(%arg0: i32) -> (i32, i32, i32) {
    %c0_i32 = arith.constant 0 : i32
    %c0_i32_0 = arith.constant 0 : i32
    %c0_i32_1 = arith.constant 0 : i32
    return %arg0, %c0_i32, %c0_i32_0 : i32, i32, i32
  }
}

</mosaic_0001>

<bundles_post_ra>
// kernel: tpu_custom_call.1
= control target key start
LH: loop header
LB: loop body
LE: loop exit
PB: predicated region body
PF: predicated region fallthrough
CT: control target
= control target key end

     0   :  { %vm59_vm0 = vcmask 1043456   ;;  %v484_v1 = vmov 0.0   ;;  %vm485_vm1 = vmmov 0   ;;  %vm49_vm2 = vcmask 64512   ;;  %s609_s0 = inlined_call_operand.vmem [shape: f32[8,128], index: 0, kind: input, shape index: {}]   ;;  %s610_s1 = inlined_call_operand.vmem [shape: f32[8,128], index: 1, kind: input, shape index: {}]   ;;  %s611_s2 = inlined_call_operand.vmem [shape: bf16[1,40,8], index: 2, kind: input, shape index: {}]   ;;  %s612_s3 = inlined_call_operand.vmem [shape: bf16[8,128], index: 3, kind: input, shape index: {}]   ;;  %s613_s4 = inlined_call_operand.vmem [shape: bf16[32,24], index: 4, kind: input, shape index: {}]   ;;  %s614_s5 = inlined_call_operand.vmem [shape: bf16[24,32], index: 5, kind: input, shape index: {}]   ;;  %s615_s6 = inlined_call_operand.vmem [shape: f32[8,1], index: 6, kind: input, shape index: {}]   ;;  %s616_s7 = inlined_call_operand.hbm [shape: f32[1,1,128], index: 7, kind: output, shape index: {}]  }
   0x1   :  { %v35_v0 = vld [vmem:[%s612_s3] sm:$0xf]  ;;  %406 = vmatprep.subr.bf16.mxu0 %v484_v1  ;;  %408 = vmatprep.mubr.msk.bf16.mxu0 %vm485_vm1, %v484_v1 }
   0x2   :  { %v61_v2 = vsel %vm59_vm0, %v35_v0, 0  ;;  %v445_v3 = vld [vmem:[%s611_s2] sm:$0xff]  }
   0x3   :  { %407 = vmatpush3.bf16.msra.mxu0 %v61_v2 }
   0x6   :  { %409 = vmatmul.mubr.msk.bf16.vlgmr.msra.gmra.mrb[0].mxu0 %vm49_vm2, %v445_v3 }
   0x7   :  { %412 = vmatprep.mubr.msk.bf16.mxu0 %vm485_vm1, %v484_v1 }
   0x8   :  { %12 = vsyncpa [#allocation3], 0  ;;  %v119_v4 = vlaneseq  ;;  %v446_v8 = vld [vmem:[%s611_s2 + $0x8] sm:$0xff]   ;;  %v28_v9 = vld [vmem:[%s609_s0] sm:$0xff]  ;;  %vm172_vm3 = vcmask 195584   ;;  %s486_s12 = smov 1  }
   0x9   :  { %v549_v10 = vld [vmem:[%s610_s1] sm:$0xff]  ;;  %v449_v21 = vld [vmem:[%s611_s2 + $0x10] ss:$0 sps:$4 sm:$0xff]   ;;  %s487_s13 = smov 127   ;;  %v448_v33 = vld [vmem:[%s613_s4 + $0x8] sm:$0xff]   ;;  %vm280_vm6 = vcmask 261120  }
   0xa   :  { %v120_v5 = vshrl.u32 %v119_v4, 7  ;;  %v447_v19 = vld [vmem:[%s613_s4] sm:$0xff]   ;;  %v131_v22 = vand.u32 127, %v119_v4  ;;  %v488_v44 = vmov 0   ;;  %vm359_vm7 = vcmask 1042434  }
   0xb   :  { %424 = vmatprep.mubr.msk.bf16.mxu1 %vm172_vm3, %v447_v19  ;;  %v450_v42 = vld [vmem:[%s614_s5] sm:$0xff]   ;;  %443 = vset.pattern.permute.xlu1 %v488_v44 }
   0xc   :  { %v121_v6 = vsub.s32 0, %v120_v5  ;;  %v126_v7 = vsub.s32 1, %v120_v5  ;;  %v136_v23 = vand.u32 15, %v131_v22  ;;  %v343_v43 = vld [vmem:[%s615_s6] sm:$0xff]  ;;  %444 = vset.pattern.permute.xlu0 %v488_v44 }
   0xd   :  { %346 = vperm.xlu1 %443, %v343_v43  }
   0xe   :  { %413 = vmatmul.mubr.msk.bf16.gmra.mrb[4].mxu0 %vm49_vm2, %v446_v8  ;;  %vm144_vm4 = vcmp.ne.s32.totalorder %v136_v23, 0  ;;  %vm147_vm5 = vcmp.ne.s32.totalorder %v136_v23, 15 }
   0xf   :  { %416 = vmatprep.mubr.msk.bf16.mxu0 %vm485_vm1, %v484_v1  ;;  %v568_v24 = vsel %vm144_vm4, 1.0, %v484_v1  ;;  %v571_v27 = vsel %vm147_vm5, 1.0, %v484_v1 }
  0x16   :  { %417 = vmatmul.mubr.msk.bf16.gmra.mrb[8].mxu0 %vm49_vm2, %v449_v21 }
  0xd9   :  { %v551_v11 = vpop.f32.mrb[0].mxu0 }
  0xda   :  { %v122_v12 = vrot.slane %v551_v11, %v121_v6  ;;  %v127_v13 = vrot.slane %v551_v11, %v126_v7  ;;  %v410_v14 = vpop.f32.mrb[1].mxu0 }
  0xdb   :  { %v100_v15 = vpop.f32.mrb[2].mxu0 }
  0xdc   :  { %v123_v16 = vmul.f32 %v122_v12, %v28_v9  ;;  %v128_v17 = vmul.f32 %v127_v13, %v549_v10  ;;  %v411_v18 = vpop.f32.mrb[3].mxu0 }
  0xde   :  { %v129_v20 = vadd.f32 %v128_v17, %v123_v16 }
  0xe0   :  { %150 = vrot.lane.b32.xlu0 %v129_v20, %s486_s12 }
  0xe1   :  { %v105_v34 = vpop.f32.mrb[4].mxu0 }
  0xe2   :  { %v414_v35 = vpop.f32.mrb[5].mxu0 }
  0xe3   :  { %v108_v36 = vpop.f32.mrb[6].mxu0 }
  0xe4   :  { %153 = vrot.lane.b32.xlu0 %v129_v20, %s487_s13  ;;  %v415_v37 = vpop.f32.mrb[7].mxu0 }
  0xe9   :  { %v113_v38 = vpop.f32.mrb[8].mxu0 }
  0xea   :  { %v418_v39 = vpop.f32.mrb[9].mxu0 }
  0xeb   :  { %v116_v40 = vpop.f32.mrb[10].mxu0 }
  0xec   :  { %v419_v41 = vpop.f32.mrb[11].mxu0 }
 0x152   :  { %v151_v25 = vpop.permute.xlu0 %150 }
 0x153   :  { %v152_v26 = vmul.f32 %v568_v24, %v151_v25 }
 0x155   :  { %v160_v28 = vpack.c.bf16 %v129_v20, %v152_v26 }
 0x156   :  { %v154_v29 = vpop.permute.xlu0 %153 }
 0x157   :  { %v155_v30 = vmul.f32 %v571_v27, %v154_v29  ;;  %420 = vmatprep.subr.bf16.mxu1 %v160_v28 }
 0x158   :  { %421 = vmatpush3.bf16.msra.mxu1 %v160_v28 }
 0x159   :  { %v161_v31 = vpack.c.bf16 %v155_v30, %v155_v30 }
 0x15b   :  { %436 = vmatprep.subr.msk.bf16.mxu1 %vm59_vm0, %v161_v31  ;;  %v180_v32 = vsel %vm59_vm0, %v161_v31, 0  ;;  %v451_v31 = vld [vmem:[%s614_s5 + $0x8] ss:$0 sps:$4 sm:$0xff]   ;;  %s489_s5 = smov [#allocation2]  }
 0x15c   :  { %423 = vmatpush3.bf16.msra.mxu1 %v180_v32  ;;  %s370_s19 = sshll.u32 %s489_s5, 4  ;;  %s371_s19 = int_to_ptr.vmem [resolvable:$true] %s370_s19 }
 0x15d   :  { %s460_s20 = scalar_lea.vmem %s371_s19, 16  ;;  %s464_s21 = scalar_lea.vmem %s371_s19, 32 }
 0x15e   :  { %p461_p0 = scmp.ne.s32.totalorder %s371_s19, %s460_s20  ;;  %p465_p1 = scmp.lt.s32.totalorder %s371_s19, %s371_s19 }
 0x15f   :  { %425 = vmatmul.mubr.msk.bf16.vlgmr.msra.gmra.mrb[0].mxu1 %vm172_vm3, %v448_v33  ;;  %p466_p2 = scmp.lt.s32.totalorder %s464_s21, %s460_s20 }
 0x160   :  { %432 = vmatprep.mubr.msk.bf16.mxu1 %vm280_vm6, %v450_v42 }
 0x161   :  { %p467_p3 = por %p466_p2, %p465_p1 }
 0x163   :  { %p468_p4 = pnand %p467_p3, %p461_p0 }
 0x232   :  { %v426_v45 = vpop.f32.mrb[0].mxu1 }
 0x233   :  { %v225_v46 = vadd.f32 %v426_v45, %v108_v36  ;;  %v216_v47 = vpop.f32.mrb[1].mxu1  ;;  %v347_v36 = vpop.permute.xlu1 %346 }
 0x234   :  { %v217_v48 = vadd.f32 %v216_v47, %v100_v15  ;;  %v427_v49 = vpop.f32.mrb[2].mxu1 }
 0x235   :  { %v237_v50 = vmul.f32 0.044715, %v225_v46  ;;  %v228_v51 = vadd.f32 %v427_v49, %v113_v38  ;;  %v219_v52 = vpop.f32.mrb[3].mxu1  ;;  %v233_v17 = vmul.f32 0.5, %v225_v46 }
 0x236   :  { %v235_v53 = vmul.f32 0.044715, %v217_v48  ;;  %v220_v54 = vadd.f32 %v219_v52, %v105_v34  ;;  %v231_v20 = vmul.f32 0.5, %v217_v48 }
 0x237   :  { %v241_v55 = vmul.f32 %v237_v50, %v225_v46  ;;  %v238_v56 = vmul.f32 0.044715, %v228_v51  ;;  %v234_v18 = vmul.f32 0.5, %v228_v51 }
 0x238   :  { %v239_v57 = vmul.f32 %v235_v53, %v217_v48  ;;  %v236_v58 = vmul.f32 0.044715, %v220_v54  ;;  %v232_v21 = vmul.f32 0.5, %v220_v54 }
 0x239   :  { %v245_v59 = vmul.f32 %v241_v55, %v225_v46  ;;  %v242_v60 = vmul.f32 %v238_v56, %v228_v51 }
 0x23a   :  { %v243_v61 = vmul.f32 %v239_v57, %v217_v48  ;;  %v240_v62 = vmul.f32 %v236_v58, %v220_v54 }
 0x23b   :  { %v246_v63 = vmul.f32 %v242_v60, %v228_v51  ;;  %v249_v0 = vadd.f32 %v245_v59, %v225_v46 }
 0x23c   :  { %v244_v1 = vmul.f32 %v240_v62, %v220_v54  ;;  %v247_v2 = vadd.f32 %v243_v61, %v217_v48 }
 0x23d   :  { %v250_v3 = vadd.f32 %v246_v63, %v228_v51  ;;  %v253_v4 = vmul.f32 0.7978846, %v249_v0 }
 0x23e   :  { %v248_v5 = vadd.f32 %v244_v1, %v220_v54  ;;  %v251_v6 = vmul.f32 0.7978846, %v247_v2 }
 0x23f   :  { %v254_v7 = vmul.f32 0.7978846, %v250_v3  ;;  %452 = vtanh.f32 %v253_v4 }
 0x240   :  { %v252_v8 = vmul.f32 0.7978846, %v248_v5  ;;  %454 = vtanh.f32 %v251_v6 }
 0x241   :  { %456 = vtanh.f32 %v254_v7 }
 0x242   :  { %458 = vtanh.f32 %v252_v8 }
 0x249   :  { %v453_v9 = vpop.eup %452 }
 0x24a   :  { %v455_v12 = vpop.eup %454  ;;  %v261_v13 = vadd.f32 1.0, %v453_v9 }
 0x24b   :  { %v457_v14 = vpop.eup %456  ;;  %v259_v15 = vadd.f32 1.0, %v455_v12 }
 0x24c   :  { %v459_v16 = vpop.eup %458  ;;  %v262_v19 = vadd.f32 1.0, %v457_v14  ;;  %v265_v23 = vmul.f32 %v261_v13, %v233_v17 }
 0x24d   :  { %v260_v22 = vadd.f32 1.0, %v459_v16  ;;  %v263_v26 = vmul.f32 %v259_v15, %v231_v20 }
 0x24e   :  { %v266_v25 = vmul.f32 %v262_v19, %v234_v18 }
 0x24f   :  { %v264_v28 = vmul.f32 %v260_v22, %v232_v21 }
 0x250   :  { %v271_v29 = vpack.c.bf16 %v266_v25, %v265_v23 }
 0x251   :  { %v270_v30 = vpack.c.bf16 %v264_v28, %v263_v26 }
 0x253   :  { %428 = vmatprep.subr.bf16.mxu1 %v270_v30 }
 0x254   :  { %429 = vmatpush3.bf16.msra.mxu1 %v270_v30 }
 0x255   :  { %430 = vmatprep.subr.bf16.mxu1 %v271_v29 }
 0x258   :  { %431 = vmatpush3.bf16.msra.mxu1 %v271_v29 }
 0x25b   :  { %433 = vmatmul.mubr.msk.bf16.vlgmr.msra.gmra.mrb[4].mxu1 %vm280_vm6, %v451_v31 }
 0x32e   :  { %v434_v32 = vpop.f32.mrb[4].mxu1 }
 0x32f   :  { %v321_v33 = vpop.f32.mrb[5].mxu1  ;;  %339 = vrot.lane.b32.xlu0 %v434_v32, %s487_s13 }
 0x330   :  { %335 = vrot.lane.b32.xlu1 %v321_v33, %s486_s12  ;;  %v435_v34 = vpop.f32.mrb[6].mxu1 }
 0x331   :  { %v324_v35 = vpop.f32.mrb[7].mxu1 }
 0x3a1   :  { %v340_v37 = vpop.permute.xlu0 %339 }
 0x3a2   :  { %v336_v38 = vpop.permute.xlu1 %335  ;;  %v341_v40 = vmul.f32 %v571_v27, %v340_v37 }
 0x3a3   :  { %v337_v39 = vmul.f32 %v568_v24, %v336_v38 }
 0x3a5   :  { %v338_v41 = vadd.f32 %v337_v39, %v324_v35 }
 0x3a7   :  { %v342_v42 = vadd.f32 %v341_v40, %v338_v41 }
 0x3a9   :  { %v349_v43 = vadd.f32 %v347_v36, %v342_v42 }
 0x3ab   :  { %v350_v44 = vsub.f32 %v349_v43, %v549_v10 }
 0x3ad   :  { %v351_v45 = vmul.f32 %v350_v44, %v350_v44 }
 0x3af   :  { %v352_v46 = vrot.slane %v351_v45, 4 }
 0x3b1   :  { %v353_v47 = vadd.f32 %v352_v46, %v351_v45 }
 0x3b3   :  { %v354_v48 = vrot.slane %v353_v47, 2 }
 0x3b5   :  { %v355_v49 = vadd.f32 %v354_v48, %v353_v47 }
 0x3b7   :  { %v356_v50 = vrot.slane %v355_v49, 1 }
 0x3b9   :  { %v357_v51 = vadd.f32 %v356_v50, %v355_v49 }
 0x3bb   :  { %v358_v52 = vmul.f32 %v357_v51, %v551_v11 }
 0x3bd   :  { %v360_v53 = vsel %vm359_vm7, %v358_v52, 0.0 }
 0x3be   :  { %361 = vadd.xlane.f32.xlu1 %v360_v53 }
 0x44b   :  { %v362_v24 = vpop.xlane.xlu1 %361 }
 0x44c   :  { %363 = vst [vmem:[#allocation2 - $0x2] sm:$0x4] %v362_v24 }
 0x44d   :  { %471 = shalt.err (!%p468_p4)
}
 0x44e   :  { %s472_s24 = scalar_lea.hbm %s616_s7, 16 }
 0x44f   :  { %p473_p5 = scmp.ne.s32.totalorder %s616_s7, %s472_s24  ;;  %p476_p6 = scmp.lt.u32.totalorder %s472_s24, %s616_s7 }
 0x451   :  { %p478_p7 = pnand %p476_p6, %p473_p5 }
 0x453   :  { %481 = shalt.err (!%p478_p7)
}
 0x454   :  { %373 = dma.vmem_to_hbm [thread:$0]  %s371_s19, 16, %s616_s7, [#allocation3]  }
 0x455   :  { %482 = dma.done.wait [#allocation3], 16  }
 0x456   :  { %483 = vsyncadd [#allocation3], 4294967280 }
 0x457   :  { %377 = vsyncpa [#allocation3], 1 }

</bundles_post_ra>
